<compile_context>
chip_gen: v7x
topology: tpu7x:2x2x1
jax: 0.10.0
libtpu: 0.0.40
codegen_flags: <defaults>
</compile_context>

<pallas_src>
import functools

import numpy as np
import jax
import jax.numpy as jnp
from jax.experimental import pallas as pl
from jax.experimental.pallas import tpu as pltpu


# ----------------------------------------------------------------------------
# Deterministic mel filterbank construction (librosa.filters.mel, slaney scale
# + slaney norm), implemented in plain numpy so no external data is needed.
# ----------------------------------------------------------------------------
def _hz_to_mel(freqs):
    freqs = np.asarray(freqs, dtype=np.float64)
    f_sp = 200.0 / 3
    mels = freqs / f_sp
    min_log_hz = 1000.0
    min_log_mel = min_log_hz / f_sp
    logstep = np.log(6.4) / 27.0
    log_t = freqs >= min_log_hz
    mels = np.where(
        log_t,
        min_log_mel + np.log(np.maximum(freqs, 1e-12) / min_log_hz) / logstep,
        mels,
    )
    return mels


def _mel_to_hz(mels):
    mels = np.asarray(mels, dtype=np.float64)
    f_sp = 200.0 / 3
    freqs = f_sp * mels
    min_log_hz = 1000.0
    min_log_mel = min_log_hz / f_sp
    logstep = np.log(6.4) / 27.0
    log_t = mels >= min_log_mel
    freqs = np.where(log_t, min_log_hz * np.exp(logstep * (mels - min_log_mel)), freqs)
    return freqs


def mel_filterbank(sr, n_fft, n_mels, fmin, fmax):
    """Returns weights of shape (n_mels, n_fft//2 + 1)."""
    n_freq = n_fft // 2 + 1
    fftfreqs = np.linspace(0.0, sr / 2.0, n_freq)
    mel_pts = np.linspace(_hz_to_mel(fmin), _hz_to_mel(fmax), n_mels + 2)
    mel_f = _mel_to_hz(mel_pts)
    fdiff = np.diff(mel_f)
    ramps = mel_f[:, None] - fftfreqs[None, :]
    weights = np.zeros((n_mels, n_freq), dtype=np.float64)
    for i in range(n_mels):
        lower = -ramps[i] / fdiff[i]
        upper = ramps[i + 2] / fdiff[i + 1]
        weights[i] = np.maximum(0.0, np.minimum(lower, upper))
    enorm = 2.0 / (mel_f[2 : n_mels + 2] - mel_f[:n_mels])
    weights *= enorm[:, None]
    return weights.astype(np.float32)


def _pick_tm(n_rows, target=1024):
    """Row-tile size.

    Picks a multiple of 8 that divides `n_rows` exactly (no row padding, no
    ragged last block) and, when possible, gives at least two grid steps so
    the "parallel" grid axis can shard rows across v7x's two TensorCores.
    Capped at `target` rows so per-step overhead is negligible while the
    double-buffered VMEM footprint stays small. Falls back to a single
    full-extent block (legal: block dim == full array dim).
    """
    if n_rows <= 8:
        return n_rows
    upper = min(target, (n_rows + 1) // 2) if n_rows >= 16 else n_rows
    upper = max(upper, 8)
    for tm in range(min(upper, n_rows), 7, -1):
        if n_rows % tm == 0 and tm % 8 == 0:
            return tm
    return n_rows  # no suitable divisor: single full-dim block


# ----------------------------------------------------------------------------
# Pallas kernel: matmul + power_to_db fused.
# ----------------------------------------------------------------------------
def _logmel_kernel(x_ref, w_ref, o_ref, *, is_log, amin, db_offset):
    # (TM, F) @ (F, M) on the MXU, accumulate in f32.
    mel = jnp.dot(x_ref[...], w_ref[...], preferred_element_type=jnp.float32)
    if is_log:
        # torch.clamp(x, min=amin, max=inf) == max(x, amin)
        clamped = jnp.maximum(mel, jnp.float32(amin))
        log_spec = 10.0 * jnp.log10(clamped) - jnp.float32(db_offset)
        o_ref[...] = log_spec.astype(o_ref.dtype)
    else:
        o_ref[...] = mel.astype(o_ref.dtype)


def logmel_filterbank(x, mel_w, *, is_log=True, ref=1.0, amin=1e-10, tm=None,
                      out_dtype=jnp.float32):
    """x: (B, C, T, F) power spectrogram; mel_w: (F, n_mels).
    Returns (B, C, T, n_mels), matching torch.matmul(input, melW) + power_to_db."""
    B, C, T, F = x.shape
    Fw, M = mel_w.shape
    assert F == Fw
    N = B * C * T

    if tm is None:
        tm = _pick_tm(N)
    assert N % tm == 0 and (tm % 8 == 0 or tm == N)

    # Contiguous reshape only: no dtype cast, no padding -> no extra HBM pass.
    x2 = x.reshape(N, F)
    w2 = mel_w

    db_offset = 10.0 * np.log10(np.maximum(amin, ref))

    kernel = functools.partial(
        _logmel_kernel, is_log=is_log, amin=amin, db_offset=db_offset
    )

    cost = pl.CostEstimate(
        flops=2 * N * F * M,
        transcendentals=N * M if is_log else 0,
        bytes_accessed=(N * F * x2.dtype.itemsize
                        + F * M * w2.dtype.itemsize
                        + N * M * jnp.dtype(out_dtype).itemsize),
    )

    out2 = pl.pallas_call(
        kernel,
        out_shape=jax.ShapeDtypeStruct((N, M), out_dtype),
        grid_spec=pltpu.PrefetchScalarGridSpec(
            num_scalar_prefetch=0,
            grid=(N // tm,),
            in_specs=[
                # Row tile of the spectrogram; full (unpadded) reduction dim.
                pl.BlockSpec((tm, F), lambda i: (i, 0)),
                # Full melW, constant index -> VMEM-resident across the grid.
                pl.BlockSpec((F, M), lambda i: (0, 0)),
            ],
            # Unpadded output: last dim equals the full mel dim (legal block).
            out_specs=pl.BlockSpec((tm, M), lambda i: (i, 0)),
        ),
        compiler_params=pltpu.CompilerParams(
            dimension_semantics=("parallel",),
        ),
        cost_estimate=cost,
    )(x2, w2)

    return out2.reshape(B, C, T, M)


# ----------------------------------------------------------------------------
# Pure-JAX reference for sanity checking.
# ----------------------------------------------------------------------------
def _reference(x, mel_w, ref=1.0, amin=1e-10):
    mel = jnp.matmul(x, mel_w)
    log_spec = 10.0 * jnp.log10(jnp.maximum(mel, amin))
    log_spec = log_spec - 10.0 * np.log10(np.maximum(amin, ref))
    return log_spec


if __name__ == "__main__":
    # Small, module-consistent shapes: sr=16000, n_fft=256 -> 129 freq bins, 64 mels.
    sr, n_fft, n_mels, fmin, fmax = 16000, 256, 64, 50, 7000
    B, C, T = 2, 1, 16
    F = n_fft // 2 + 1  # 129

    # Deterministic parameter init (librosa-style mel filterbank, transposed).
    mel_w = jnp.asarray(mel_filterbank(sr, n_fft, n_mels, fmin, fmax).T)  # (F, n_mels)

    # Deterministic non-negative "power spectrogram" input.
    key = jax.random.PRNGKey(0)
    x = jax.random.uniform(key, (B, C, T, F), dtype=jnp.float32) ** 2

    out = logmel_filterbank(x, mel_w, is_log=True, ref=1.0, amin=1e-10)
    out = jax.block_until_ready(out)

    ref_out = _reference(x, mel_w)
    np.testing.assert_allclose(np.asarray(out), np.asarray(ref_out), rtol=1e-4, atol=1e-4)

    assert out.shape == (B, C, T, n_mels)
    # TODO(synk): top_db clamp is not applied (matches the provided power_to_db,
    # which returns before using top_db).
    print("KERNEL_OK")
</pallas_src>

<mosaic_0001>
module attributes {stable_mosaic.version = 11 : i64} {
  func.func @_logmel_kernel(%arg0: i32, %arg1: memref<16x129xf32, #tpu.memory_space<vmem>>, %arg2: memref<129x64xf32, #tpu.memory_space<vmem>>, %arg3: memref<16x64xf32, #tpu.memory_space<vmem>>) attributes {dimension_semantics = [#tpu.dimension_semantics<parallel>], iteration_bounds = array<i64: 2>, scalar_prefetch = 0 : i64, scratch_operands = 0 : i64, tpu.core_type = #tpu.core_type<tc>, window_params = [{transform_indices = @transform_0, window_bounds = array<i64: 16, 129>}, {pipeline_mode = #tpu.pipeline_mode<synchronous>, transform_indices = @transform_1, window_bounds = array<i64: 129, 64>}, {transform_indices = @transform_2, window_bounds = array<i64: 16, 64>}]} {
    %c0 = arith.constant 0 : index
    %c0_0 = arith.constant 0 : index
    %0 = vector.load %arg1[%c0, %c0_0] : memref<16x129xf32, #tpu.memory_space<vmem>>, vector<16x129xf32>
    %c0_1 = arith.constant 0 : index
    %c0_2 = arith.constant 0 : index
    %1 = vector.load %arg2[%c0_1, %c0_2] : memref<129x64xf32, #tpu.memory_space<vmem>>, vector<129x64xf32>
    %cst = arith.constant dense<0.000000e+00> : vector<16x64xf32>
    %2 = tpu.matmul %0, %1, %cst {dimension_numbers = #tpu.dot_dimension_numbers<[1], [0], [0], [1], [0, 0, 1, 1], [], []>} : vector<16x129xf32>, vector<129x64xf32>, vector<16x64xf32> -> vector<16x64xf32>
    %cst_3 = arith.constant 1.000000e-10 : f32
    %3 = vector.broadcast %cst_3 : f32 to vector<16x64xf32>
    %4 = arith.maximumf %2, %3 : vector<16x64xf32>
    %5 = math.log %4 : vector<16x64xf32>
    %cst_4 = arith.constant 0.434294492 : f32
    %6 = vector.broadcast %cst_4 : f32 to vector<16x64xf32>
    %7 = arith.mulf %5, %6 : vector<16x64xf32>
    %cst_5 = arith.constant 1.000000e+01 : f32
    %8 = vector.broadcast %cst_5 : f32 to vector<16x64xf32>
    %9 = arith.mulf %8, %7 : vector<16x64xf32>
    %cst_6 = arith.constant 0.000000e+00 : f32
    %10 = vector.broadcast %cst_6 : f32 to vector<16x64xf32>
    %11 = arith.subf %9, %10 : vector<16x64xf32>
    %c0_7 = arith.constant 0 : index
    %c0_8 = arith.constant 0 : index
    %12 = vector.load %arg3[%c0_7, %c0_8] : memref<16x64xf32, #tpu.memory_space<vmem>>, vector<16x64xf32>
    tpu.vector_store %arg3[%c0_7, %c0_8], %11 {strides = array<i32>} : memref<16x64xf32, #tpu.memory_space<vmem>>, vector<16x64xf32>,
    return
  }
  func.func @transform_0(%arg0: i32) -> (i32, i32) {
    %c0_i32 = arith.constant 0 : i32
    %c0_i32_0 = arith.constant 0 : i32
    return %arg0, %c0_i32 : i32, i32
  }
  func.func @transform_1(%arg0: i32) -> (i32, i32) {
    %c0_i32 = arith.constant 0 : i32
    %c0_i32_0 = arith.constant 0 : i32
    %c0_i32_1 = arith.constant 0 : i32
    return %c0_i32, %c0_i32_0 : i32, i32
  }
  func.func @transform_2(%arg0: i32) -> (i32, i32) {
    %c0_i32 = arith.constant 0 : i32
    %c0_i32_0 = arith.constant 0 : i32
    return %arg0, %c0_i32 : i32, i32
  }
}

</mosaic_0001>

<bundles_post_ra>
// kernel: tpu_custom_call.1
= control target key start
LH: loop header
LB: loop body
LE: loop exit
PB: predicated region body
PF: predicated region fallthrough
CT: control target
= control target key end

     0   :  { %7 = vsyncpa [#allocation3], 0  ;;  %s694_s0 = inlined_call_operand.vmem [shape: f32[32,129], index: 0, kind: input, shape index: {}]   ;;  %s695_s1 = inlined_call_operand.vmem [shape: f32[129,64], index: 1, kind: input, shape index: {}]   ;;  %s696_s2 = inlined_call_operand.hbm [shape: f32[32,64], index: 2, kind: output, shape index: {}]  }
   0x1   :  { %9 = vsyncpa [#allocation3 + $0x1], 0  ;;  %s535_s9 = smov 0   ;;  %s537_s10 = smov 0  }
   0x2   :  { %s539_s11 = smov 0   ;;  %s541_s12 = smov 0  }
   0x3 LB: > { %s556_s13 = sadd.s32 4294967295, %s513_s12   ;;  %s344_s14 = sadd.s32 4294967294, %s513_s12   ;;  %s513_s12 = sphi %s541_s12, %s702_s12   ;;  %s509_s11 = sphi %s539_s11, %s701_s11   ;;  %s505_s10 = sphi %s537_s10, %s700_s10   ;;  %s501_s9 = sphi %s535_s9, %s699_s9  }
   0x4   : > { %s560_s15 = sadd.s32 1, %s513_s12   ;;  %s69_s16 = sadd.s32 1, %s509_s11 }
   0x5   : > { %s66_s17 = ssub.s32 %s513_s12, %s560_s15  ;;  %p79_p0 = scmp.ne.s32.totalorder %s509_s11, %s505_s10 }
   0x6   : > { %p67_p1 = scmp.eq.s32.totalorder %s66_s17, 0  ;;  %p80_p2 = scmp.eq.s32.totalorder %s556_s13, 1 }
   0x7   : > { %p85_p3 = scmp.ne.s32.totalorder %s505_s10, %s501_s9  ;;  %p86_p4 = scmp.eq.s32.totalorder %s344_s14, 1 }
   0x8   : > { %s571_s18 = scalar_select %p67_p1, %s509_s11, %s69_s16  }
   0x9   : > { %p573_p5 = por %p80_p2, %p79_p0  ;;  %p577_p6 = por %p86_p4, %p85_p3 }
   0xa   : > { %p347_p7 = scmp.ge.s32.totalorder %s513_s12, 1  ;;  %p117_p8 = scmp.lt.s32.totalorder %s513_s12, 3 }
   0xc   : > { %p118_p9 = pnand %p347_p7, %p117_p8 }
   0xd   : > { %v152_v0 = vld [vmem:[%s695_s1] sm:$0xff] (!%p118_p9)  ;;  %v153_v1 = vld [vmem:[%s695_s1 + $0x8] sm:$0xff] (!%p118_p9)  ;;  %v154_v2 = vld [vmem:[%s695_s1 + $0x10] sm:$0xff] (!%p118_p9)  ;;  %v515_v3 = vmov (!%p118_p9), 0.0|0.0   ;;  %s349_s29 = sshll.u32 (!%p118_p9), %s556_s13, 1  ;;  %vm169_vm0 = vcmask (!%p118_p9), 7168  }
   0xe   : > { %121 = sbr.rel (%p118_p9) target bundleno = 296 (0x128), region = 28  ;;  %362 = vmatprep.subr.bf16.mxu0 (!%p118_p9), %v515_v3  ;;  %386 = vmatprep.subr.bf16.mxu1 (!%p118_p9), %v515_v3  ;;  %v363_v4 = vpack.c.bf16 (!%p118_p9), %v153_v1, %v152_v0  ;;  %v155_v5 = vld [vmem:[%s695_s1 + $0x18] sm:$0xff] (!%p118_p9)  ;;  %p141_p10 = scmp.lt.s32.totalorder (!%p118_p9), %s349_s29, 3  ;;  %v156_v7 = vld [vmem:[%s695_s1 + $0x20] sm:$0xff] (!%p118_p9)  ;;  %v157_v8 = vld [vmem:[%s695_s1 + $0x28] sm:$0xff] (!%p118_p9)  ;;  %v516_v27 = vmov (!%p118_p9), 0.0  }
   0xf   : > { %v366_v6 = vpack.c.bf16 (!%p118_p9), %v155_v5, %v154_v2  ;;  %v369_v9 = vpack.c.bf16 (!%p118_p9), %v157_v8, %v156_v7  ;;  %v158_v10 = vld [vmem:[%s695_s1 + $0x30] sm:$0xff] (!%p118_p9)  ;;  %v159_v11 = vld [vmem:[%s695_s1 + $0x38] sm:$0xff] (!%p118_p9)  ;;  %v160_v15 = vld [vmem:[%s695_s1 + $0x40] sm:$0xff] (!%p118_p9)  ;;  %vm176_vm1 = vcmask (!%p118_p9), 1040384   ;;  %s137_s23 = sand.u32 (!%p118_p9), 1, %s505_s10   ;;  %vm265_vm2 = vcmask (!%p118_p9), 523264  }
  0x10   : > { %364 = vmatpush1.bf16.msra.mxu0 (!%p118_p9), %v363_v4  ;;  %395 = vmatpush1.bf16.msra.mxu1 (!%p118_p9), %v363_v4  ;;  %v372_v14 = vpack.c.bf16 (!%p118_p9), %v159_v11, %v158_v10  ;;  %v161_v16 = vld [vmem:[%s695_s1 + $0x48] sm:$0xff] (!%p118_p9)  ;;  %v162_v18 = vld [vmem:[%s695_s1 + $0x50] sm:$0xff] (!%p118_p9)  ;;  %v163_v19 = vld [vmem:[%s695_s1 + $0x58] sm:$0xff] (!%p118_p9)  ;;  %s348_s24 = sshll.u32 (!%p118_p9), %s137_s23, 4  ;;  %s517_s3 = smov (!%p118_p9), [#allocation2]  }
  0x11   : > { %365 = vmatprep.subr.bf16.mxu0 (!%p118_p9), %v515_v3  ;;  %387 = vmatprep.subr.bf16.mxu1 (!%p118_p9), %v515_v3  ;;  %v375_v17 = vpack.c.bf16 (!%p118_p9), %v161_v16, %v160_v15  ;;  %v378_v20 = vpack.c.bf16 (!%p118_p9), %v163_v19, %v162_v18  ;;  %v164_v21 = vld [vmem:[%s695_s1 + $0x60] sm:$0xff] (!%p118_p9)  ;;  %v165_v22 = vld [vmem:[%s695_s1 + $0x68] sm:$0xff] (!%p118_p9)  ;;  %v166_v24 = vld [vmem:[%s695_s1 + $0x70] sm:$0xff] (!%p118_p9)  ;;  %s139_s25 = scalar_lea.vmem (!%p118_p9), [#allocation2], %s348_s24  ;;  %s455_s4 = sshll.u32 (!%p118_p9), %s517_s3, 4  ;;  %s456_s4 = int_to_ptr.vmem [resolvable:$false] %s455_s4 }
  0x12   : > { %v381_v23 = vpack.c.bf16 (!%p118_p9), %v165_v22, %v164_v21  ;;  %v167_v25 = vld [vmem:[%s695_s1 + $0x78] sm:$0xff] (!%p118_p9)  ;;  %v168_v28 = vld [vmem:[%s695_s1 + $0x80] sm:$0x1] (!%p118_p9)  ;;  %s282_s26 = sshll.u32 (!%p118_p9), %s139_s25, 4  ;;  %s457_s5 = scalar_lea.vmem (!%p118_p9), %s456_s4, 512  ;;  %s651_s26 = int_to_ptr.vmem [resolvable:$true] %s282_s26 }
  0x13   : > { %v384_v26 = vpack.c.bf16 (!%p118_p9), %v167_v25, %v166_v24  ;;  %s451_s30 = scalar_lea.vmem (!%p118_p9), %s651_s26, 256  ;;  %p458_p0 = scmp.lt.s32.totalorder (!%p118_p9), %s651_s26, %s456_s4 }
  0x14   : > { %367 = vmatpush1.bf16.msra.mxu0 (!%p118_p9), %v366_v6  ;;  %396 = vmatpush1.bf16.msra.mxu1 (!%p118_p9), %v366_v6  ;;  %p452_p11 = scmp.ne.s32.totalorder (!%p118_p9), %s651_s26, %s451_s30  ;;  %p459_p1 = scmp.lt.s32.totalorder (!%p118_p9), %s457_s5, %s451_s30 }
  0x15   : > { %s704_s29 = smov (!%p141_p10, %s349_s29), 3  ;;  %368 = vmatprep.subr.bf16.mxu0 %v515_v3  ;;  %388 = vmatprep.subr.bf16.mxu1 %v515_v3 }
  0x16   : > { %s360_s6 = sshll.u32 %s704_s29, 4  ;;  %p453_p12 = pnand %p452_p11, %p573_p5 }
  0x17   : > { %s608_s17 = scalar_lea.vmem %s694_s0, %s360_s6  ;;  %p460_p2 = por %p459_p1, %p458_p0 }
  0x18   : > { %v149_v12 = vld [vmem:[%s608_s17 + $0x8] sm:$0xff]  ;;  %v151_v13 = vld [vmem:[%s608_s17 + $0x18] sm:$0xff]  ;;  %370 = vmatpush1.bf16.msra.mxu0 %v369_v9  ;;  %397 = vmatpush1.bf16.msra.mxu1 %v369_v9  ;;  %v148_v29 = vld [vmem:[%s608_s17] sm:$0xff]  ;;  %p454_p13 = pneg %p453_p12 }
  0x19   : > { %353 = vmatprep.mubr.msk.f32.mxu0 %vm169_vm0, %v149_v12  ;;  %354 = vmatprep.mubr.msk.f32.mxu1 %vm169_vm0, %v151_v13  ;;  %v150_v30 = vld [vmem:[%s608_s17 + $0x10] sm:$0xff]  ;;  %s361_s17 = sshll.u32 %s556_s13, 8  ;;  %s653_s13 = scalar_lea.sflag [#allocation3], %s137_s23 }
  0x1a   : > { %371 = vmatprep.subr.bf16.mxu0 %v515_v3  ;;  %389 = vmatprep.subr.bf16.mxu1 %v515_v3  ;;  %s649_s29 = scalar_lea.hbm %s696_s2, %s361_s17  ;;  %p461_p3 = pnand %p460_p2, %p454_p13 }
  0x1c   : > { %373 = vmatpush1.bf16.msra.mxu0 %v372_v14  ;;  %398 = vmatpush1.bf16.msra.mxu1 %v372_v14 }
  0x1d   : > { %374 = vmatprep.subr.bf16.mxu0 %v515_v3  ;;  %390 = vmatprep.subr.bf16.mxu1 %v515_v3 }
  0x20   : > { %376 = vmatpush1.bf16.msra.mxu0 %v375_v17  ;;  %399 = vmatpush1.bf16.msra.mxu1 %v375_v17 }
  0x21   : > { %377 = vmatprep.subr.bf16.mxu0 %v515_v3  ;;  %391 = vmatprep.subr.bf16.mxu1 %v515_v3 }
  0x24   : > { %379 = vmatpush1.bf16.msra.mxu0 %v378_v20  ;;  %400 = vmatpush1.bf16.msra.mxu1 %v378_v20 }
  0x25   : > { %380 = vmatprep.subr.bf16.mxu0 %v515_v3  ;;  %392 = vmatprep.subr.bf16.mxu1 %v515_v3 }
  0x28   : > { %382 = vmatpush1.bf16.msra.mxu0 %v381_v23  ;;  %401 = vmatpush1.bf16.msra.mxu1 %v381_v23 }
  0x29   : > { %383 = vmatprep.subr.bf16.mxu0 %v515_v3  ;;  %393 = vmatprep.subr.bf16.mxu1 %v515_v3 }
  0x2c   : > { %385 = vmatpush1.bf16.msra.mxu0 %v384_v26  ;;  %402 = vmatpush1.bf16.msra.mxu1 %v384_v26 }
  0x2d   : > { %212 = vmatprep.subr.mxu0 %v516_v27  ;;  %394 = vmatprep.subr.mxu1 %v516_v27 }
  0x30   : > { %352 = vmatpush1.msk.msra.mxu0 %vm176_vm1, %v168_v28  ;;  %403 = vmatpush1.msk.msra.mxu1 %vm176_vm1, %v168_v28 }
  0x31   : > { %245 = vmatmul.mubr.f32.vlgmr.msra.gmra.mrb[0].mxu0 %v148_v29  ;;  %250 = vmatmul.mubr.f32.vlgmr.msra.gmra.mrb[0].mxu1 %v150_v30 }
 0x104   : > { %v246_v31 = vpop.f32.mrb[0].mxu0  ;;  %v251_v32 = vpop.f32.mrb[0].mxu1 }
 0x105   : > { %v255_v33 = vmax.f32 %v246_v31, 1e-10  ;;  %v256_v34 = vmax.f32 %v251_v32, 1e-10  ;;  %v248_v35 = vpop.f32.mrb[1].mxu0  ;;  %v253_v36 = vpop.f32.mrb[1].mxu1 }
 0x107   : > { %447 = vlog2.f32 %v255_v33 }
 0x108   : > { %449 = vlog2.f32 %v256_v34 }
 0x111   : > { %v448_v37 = vpop.eup %447 }
 0x112   : > { %v450_v38 = vpop.eup %449  ;;  %v258_v39 = vmul.f32 0.6931472, %v448_v37 }
 0x113   : > { %v260_v40 = vmul.f32 0.6931472, %v450_v38 }
 0x114   : > { %v261_v41 = vmul.f32 0.4342945, %v258_v39 }
 0x115   : > { %v262_v42 = vmul.f32 0.4342945, %v260_v40 }
 0x116   : > { %v263_v43 = vmul.f32 10.0, %v261_v41 }
 0x117   : > { %v264_v44 = vmul.f32 10.0, %v262_v42 }
 0x118   : > { %266 = vst.msk [vmem:[%s139_s25] sm:$0xff] %vm265_vm2, %v263_v43 }
 0x119   : > { %267 = vst.msk [vmem:[%s139_s25 + $0x8] sm:$0xff] %vm265_vm2, %v264_v44 }
 0x11a   : > { %464 = shalt.err (!%p461_p3)
}
 0x11b   : > { %s465_s6 = scalar_lea.hbm %s649_s29, 256  ;;  %s469_s14 = scalar_lea.hbm %s696_s2, 512 }
 0x11c   : > { %p466_p4 = scmp.ne.s32.totalorder %s649_s29, %s465_s6  ;;  %p470_p9 = scmp.lt.u32.totalorder %s649_s29, %s696_s2 }
 0x11d   : > { %p471_p10 = scmp.lt.u32.totalorder %s469_s14, %s465_s6  ;;  %p473_p12 = scmp.lt.u32.totalorder %s465_s6, %s649_s29 }
 0x11e   : > { %p467_p7 = pnand %p466_p4, %p573_p5 }
 0x11f   : > { %p472_p11 = por %p471_p10, %p470_p9 }
 0x120   : > { %p468_p8 = pneg %p467_p7 }
 0x121   : > { %p474_p13 = por %p473_p12, %p472_p11 }
 0x123   : > { %p475_p0 = pnand %p474_p13, %p468_p8 }
 0x125   : > { %478 = shalt.err (!%p475_p0)
}
 0x126   : > { %s518_s22 = smov 128   ;;  %s519_s23 = smov 8  }
 0x127   : > { %404 = dma.vmem_to_hbm [thread:$0]  (%p573_p5), %s651_s26, 256, %s649_s29, %s653_s13, %s518_s22, %s518_s22, %s519_s23  }
 0x128 PF: > { %p410_p1 = scmp.ge.s32.totalorder %s513_s12, 2  ;;  %s297_s24 = sand.u32 1, %s501_s9  }
 0x129   : > { %s298_s17 = scalar_lea.sflag [#allocation3], %s297_s24 }
 0x12a   : > { %p407_p2 = pnand %p410_p1, %p577_p6 }
 0x12c   : > { %496 = dma.done.wait (!%p407_p2), %s298_s17, 256  }
 0x12d   : > { %498 = vsyncadd (!%p407_p2), %s298_s17, 4294967040  ;;  %p12_p3 = scmp.ge.s32.totalorder %s560_s15, 4   ;;  %s699_s9 = smov %s505_s10 }
 0x12e   : > { %s700_s10 = smov %s509_s11  ;;  %s701_s11 = smov %s571_s18 }
 0x12f   : > { %s702_s12 = smov %s560_s15  ;;  %14 = sbr.rel (!%p12_p3) target bundleno = 3 (0x3), region = 63 }
 0x136   :  { %303 = vsyncpa [#allocation3], 1 }
 0x137   :  { %305 = vsyncpa [#allocation3 + $0x1], 1 }

</bundles_post_ra>
